<compile_context>
chip_gen: v6e
topology: v6e:2x2x1
jax: 0.10.0
libtpu: 0.0.40
codegen_flags: <defaults>
</compile_context>

<pallas_src>
import functools

import jax
import jax.numpy as jnp
from jax.experimental import pallas as pl
from jax.experimental.pallas import tpu as pltpu


def _round_up(x, m):
    return (x + m - 1) // m * m


def _build_kernel(M, T, tap_offsets, tap_needs_mask, slack_lo, chunks):
    """Returns the Pallas kernel body (all tap/chunk structure is static Python)."""

    def kernel(x_ref, scale_ref, bias_ref, w_ref, mask_ref, o_ref, hp_ref):
        # x_ref    : (1, Cin, M)      input dtype (f32 or bf16)
        # scale_ref: (Cin, 1) f32,  bias_ref: (Cin, 1) f32   (folded BN, inference)
        # w_ref    : (T, Cout, Cin)   compute dtype, block-diagonal over groups
        # mask_ref : (T, M)           compute dtype, 1.0 = tap in range, 0.0 = zero pad
        # o_ref    : (1, Cout, M) f32 (dense stride-1 output, lane-dense)
        # hp_ref   : (Cin, P)         compute dtype scratch (flat activations + slack)

        # Fused BatchNorm (inference) + ReLU in f32, cast once for the MXU.
        x = x_ref[0].astype(jnp.float32)                          # (Cin, M)
        h = jnp.maximum(x * scale_ref[...] + bias_ref[...], 0.0)
        hp_ref[:, slack_lo:slack_lo + M] = h.astype(hp_ref.dtype)
        # Slack columns outside [slack_lo, slack_lo+M) are never written; any read that
        # lands there is removed by the per-tap mask (a select, never a multiply), so no
        # zero-fill of a padded scratch is needed.

        for c0, cw in chunks:                                     # static chunk loop
            acc = None
            for t in range(T):                                    # static tap loop
                s = slack_lo + tap_offsets[t] + c0
                rhs = hp_ref[:, s:s + cw]                         # (Cin, cw) lane slice
                if tap_needs_mask[t]:
                    mv = mask_ref[t:t + 1, c0:c0 + cw]            # (1, cw)
                    rhs = jnp.where(mv > 0.5, rhs, jnp.zeros_like(rhs))
                part = jnp.dot(w_ref[t], rhs,
                               preferred_element_type=jnp.float32)  # (Cout, cw)
                acc = part if acc is None else acc + part
            o_ref[0, :, c0:c0 + cw] = acc.astype(o_ref.dtype)     # lane-dense store

    return kernel


def dilated_conv3d_block(x_ncdhw, weight, gamma, beta, running_mean, running_var,
                         *, kernel_size, stride=1, groups=1, dilation=(1, 1, 1),
                         eps=1e-5, compute_dtype=jnp.bfloat16):
    """PyTorch-equivalent forward: relu(bn_eval(x)) -> dilated grouped conv3d, no bias.

    x_ncdhw : (N, Cin, D, H, W)            PyTorch NCDHW input
    weight  : (Cout, Cin//groups, KD, KH, KW)
    returns : (N, Cout, Do, Ho, Wo) float32
    Note: BatchNorm uses running statistics (inference mode).
    """
    N, Cin, D, H, W = x_ncdhw.shape
    Cout = weight.shape[0]
    KD, KH, KW = kernel_size
    dd, dh, dw = dilation
    sd, sh, sw = (stride,) * 3 if isinstance(stride, int) else tuple(stride)
    pd, ph, pw = (KD - 1) // 2 * dd, (KH - 1) // 2 * dh, (KW - 1) // 2 * dw
    Do = (D + 2 * pd - dd * (KD - 1) - 1) // sd + 1
    Ho = (H + 2 * ph - dh * (KH - 1) - 1) // sh + 1
    Wo = (W + 2 * pw - dw * (KW - 1) - 1) // sw + 1
    Cin_g, Cout_g = Cin // groups, Cout // groups
    M = D * H * W
    T = KD * KH * KW

    # --- static tap structure ------------------------------------------------------
    taps = [(kd, kh, kw) for kd in range(KD) for kh in range(KH) for kw in range(KW)]
    offs, needs_mask = [], []
    for kd, kh, kw in taps:
        od, oh, ow = kd * dd - pd, kh * dh - ph, kw * dw - pw
        offs.append(od * H * W + oh * W + ow)
        needs_mask.append(not (od == 0 and oh == 0 and ow == 0))
    o_min, o_max = min(offs), max(offs)
    slack_lo = _round_up(max(-o_min, 0), 128)          # lane-aligned interior write
    P = _round_up(slack_lo + M + max(o_max, 0), 128)

    # lane-axis chunking: keep the (Cout, chunk) f32 accumulator around <=64 KiB of vregs
    ch = max(128, ((64 * 1024) // (4 * Cout)) // 128 * 128)
    ch = min(ch, M)
    chunks = [(c0, min(ch, M - c0)) for c0 in range(0, M, ch)]

    # --- precomputed per-tap validity masks (virtual zero padding), shape (T, M) ----
    m_idx = jnp.arange(M, dtype=jnp.int32)
    d_i = m_idx // (H * W)
    h_i = (m_idx // W) % H
    w_i = m_idx % W
    masks = []
    for kd, kh, kw in taps:
        od, oh, ow = kd * dd - pd, kh * dh - ph, kw * dw - pw
        masks.append((d_i + od >= 0) & (d_i + od < D) &
                     (h_i + oh >= 0) & (h_i + oh < H) &
                     (w_i + ow >= 0) & (w_i + ow < W))
    mask_arr = jnp.stack(masks).astype(compute_dtype)

    # --- block-diagonal weight (groups folded): (T, Cout, Cin) ----------------------
    w_t = jnp.transpose(weight, (2, 3, 4, 0, 1)).reshape(T, Cout, Cin_g)
    w_bd = jnp.zeros((T, Cout, Cin), dtype=jnp.float32)
    for gi in range(groups):
        ro = slice(gi * Cout_g, (gi + 1) * Cout_g)
        co = slice(gi * Cin_g, (gi + 1) * Cin_g)
        w_bd = w_bd.at[:, ro, co].set(w_t[:, ro, :].astype(jnp.float32))
    w_bd = w_bd.astype(compute_dtype)
    # TODO(synk): for very large `groups` (e.g. depthwise) the block-diagonal weight wastes
    # MXU flops by a factor of `groups`; a per-group lane-offset accumulation would be better.

    # --- BatchNorm (inference) folded to per-channel scale / bias -------------------
    inv_std = 1.0 / jnp.sqrt(running_var.astype(jnp.float32) + eps)
    scale = (gamma * inv_std).reshape(Cin, 1).astype(jnp.float32)
    bias = (beta - running_mean * gamma * inv_std).reshape(Cin, 1).astype(jnp.float32)

    # channels-first, spatially-flattened input (NCDHW is already channels-first -> free)
    x_flat = x_ncdhw.reshape(N, Cin, M).astype(compute_dtype)

    kernel = _build_kernel(M, T, offs, needs_mask, slack_lo, chunks)

    out_flat = pl.pallas_call(
        kernel,
        out_shape=jax.ShapeDtypeStruct((N, Cout, M), jnp.float32),
        grid_spec=pltpu.PrefetchScalarGridSpec(
            num_scalar_prefetch=0,
            grid=(N,),
            in_specs=[
                pl.BlockSpec((1, Cin, M), lambda n: (n, 0, 0)),       # x (per-sample)
                pl.BlockSpec((Cin, 1), lambda n: (0, 0)),             # BN scale
                pl.BlockSpec((Cin, 1), lambda n: (0, 0)),             # BN bias
                pl.BlockSpec((T, Cout, Cin), lambda n: (0, 0, 0)),    # block-diag weight
                pl.BlockSpec((T, M), lambda n: (0, 0)),               # tap masks
            ],
            out_specs=pl.BlockSpec((1, Cout, M), lambda n: (n, 0, 0)),
            scratch_shapes=[pltpu.VMEM((Cin, P), compute_dtype)],
        ),
        compiler_params=pltpu.CompilerParams(
            dimension_semantics=("parallel",),      # megacore-shard batch on v7x
            vmem_limit_bytes=64 * 1024 * 1024,      # raise scoped-VMEM cap (tune per gen)
        ),
    )(x_flat, scale, bias, w_bd, mask_arr)

    # dense stride-1 output -> PyTorch NCDHW output (free XLA layout plumbing)
    out = out_flat.reshape(N, Cout, D, H, W)
    out = out[:, :,
              0:(Do - 1) * sd + 1:sd,
              0:(Ho - 1) * sh + 1:sh,
              0:(Wo - 1) * sw + 1:sw]
    return out


def _reference(x_ncdhw, weight, gamma, beta, running_mean, running_var,
               *, kernel_size, stride, groups, dilation, eps=1e-5):
    """Pure-JAX reference: BN(eval)+ReLU then lax dilated grouped conv3d."""
    strides = (stride,) * 3 if isinstance(stride, int) else tuple(stride)
    inv_std = 1.0 / jnp.sqrt(running_var + eps)
    c = (None, slice(None), None, None, None)
    h = (x_ncdhw - running_mean[c]) * (gamma * inv_std)[c] + beta[c]
    h = jnp.maximum(h, 0.0)
    h_ndhwc = jnp.transpose(h, (0, 2, 3, 4, 1))
    w_dhwio = jnp.transpose(weight, (2, 3, 4, 1, 0))
    pads = [((k - 1) // 2 * d,) * 2 for k, d in zip(kernel_size, dilation)]
    out = jax.lax.conv_general_dilated(
        h_ndhwc, w_dhwio, window_strides=strides, padding=pads,
        rhs_dilation=dilation,
        dimension_numbers=("NDHWC", "DHWIO", "NDHWC"),
        feature_group_count=groups)
    return jnp.transpose(out, (0, 4, 1, 2, 3))


if __name__ == "__main__":
    N, Cin, D, H, W = 2, 4, 8, 8, 8
    Cout = 8

    key = jax.random.PRNGKey(0)
    k_x, k_w, k_g, k_b, k_m, k_v, k_w2 = jax.random.split(key, 7)
    x = jax.random.normal(k_x, (N, Cin, D, H, W), dtype=jnp.float32)
    gamma = 1.0 + 0.1 * jax.random.normal(k_g, (Cin,), dtype=jnp.float32)
    beta = 0.1 * jax.random.normal(k_b, (Cin,), dtype=jnp.float32)
    running_mean = 0.1 * jax.random.normal(k_m, (Cin,), dtype=jnp.float32)
    running_var = jnp.abs(jax.random.normal(k_v, (Cin,), dtype=jnp.float32)) + 0.5

    # Config A: typical DMFNet usage -- asymmetric kernel, spatial dilation, grouped conv.
    ks_a, dil_a, g_a, st_a = (1, 3, 3), (1, 2, 2), 2, 1
    w_a = 0.1 * jax.random.normal(k_w, (Cout, Cin // g_a) + ks_a, dtype=jnp.float32)
    ref_a = _reference(x, w_a, gamma, beta, running_mean, running_var,
                       kernel_size=ks_a, stride=st_a, groups=g_a, dilation=dil_a)
    ref_a = jax.block_until_ready(ref_a)

    fn_a = functools.partial(dilated_conv3d_block, kernel_size=ks_a, stride=st_a,
                             groups=g_a, dilation=dil_a)

    # f32 path (strict check)
    out_a32 = jax.block_until_ready(
        fn_a(x, w_a, gamma, beta, running_mean, running_var,
             compute_dtype=jnp.float32))
    assert out_a32.shape == ref_a.shape, (out_a32.shape, ref_a.shape)
    err32 = float(jnp.max(jnp.abs(out_a32 - ref_a)))
    assert err32 < 1e-3, f"f32 path max abs err {err32}"

    # bf16 data path (default per perf review), f32 accumulation
    out_a16 = jax.block_until_ready(
        fn_a(x, w_a, gamma, beta, running_mean, running_var,
             compute_dtype=jnp.bfloat16))
    err16 = float(jnp.max(jnp.abs(out_a16 - ref_a)))
    assert err16 < 6e-2, f"bf16 path max abs err {err16}"

    # Config B: cubic kernel, stride 2, ungrouped (exercises the stride / crop path).
    ks_b, dil_b, g_b, st_b = (3, 3, 3), (1, 1, 1), 1, 2
    w_b = 0.1 * jax.random.normal(k_w2, (Cout, Cin) + ks_b, dtype=jnp.float32)
    ref_b = _reference(x, w_b, gamma, beta, running_mean, running_var,
                       kernel_size=ks_b, stride=st_b, groups=g_b, dilation=dil_b)
    out_b = jax.block_until_ready(
        dilated_conv3d_block(x, w_b, gamma, beta, running_mean, running_var,
                             kernel_size=ks_b, stride=st_b, groups=g_b,
                             dilation=dil_b, compute_dtype=jnp.float32))
    assert out_b.shape == ref_b.shape, (out_b.shape, ref_b.shape)
    errb = float(jnp.max(jnp.abs(out_b - ref_b)))
    assert errb < 1e-3, f"stride-2 path max abs err {errb}"

    print("KERNEL_OK")
</pallas_src>

<mosaic_0001>
module attributes {stable_mosaic.version = 11 : i64} {
  func.func @kernel(%arg0: i32, %arg1: memref<1x4x512xf32, #tpu.memory_space<vmem>>, %arg2: memref<4x1xf32, #tpu.memory_space<vmem>>, %arg3: memref<4x1xf32, #tpu.memory_space<vmem>>, %arg4: memref<9x8x4xf32, #tpu.memory_space<vmem>>, %arg5: memref<9x512xf32, #tpu.memory_space<vmem>>, %arg6: memref<1x8x512xf32, #tpu.memory_space<vmem>>, %arg7: memref<4x768xf32, #tpu.memory_space<vmem>>) attributes {dimension_semantics = [#tpu.dimension_semantics<parallel>], iteration_bounds = array<i64: 2>, scalar_prefetch = 0 : i64, scratch_operands = 1 : i64, tpu.core_type = #tpu.core_type<tc>, window_params = [{transform_indices = @transform_0, window_bounds = array<i64: 1, 4, 512>}, {pipeline_mode = #tpu.pipeline_mode<synchronous>, transform_indices = @transform_1, window_bounds = array<i64: 4, 1>}, {pipeline_mode = #tpu.pipeline_mode<synchronous>, transform_indices = @transform_2, window_bounds = array<i64: 4, 1>}, {pipeline_mode = #tpu.pipeline_mode<synchronous>, transform_indices = @transform_3, window_bounds = array<i64: 9, 8, 4>}, {pipeline_mode = #tpu.pipeline_mode<synchronous>, transform_indices = @transform_4, window_bounds = array<i64: 9, 512>}, {transform_indices = @transform_5, window_bounds = array<i64: 1, 8, 512>}]} {
    %c0 = arith.constant 0 : index
    %c0_0 = arith.constant 0 : index
    %c0_1 = arith.constant 0 : index
    %0 = vector.load %arg1[%c0, %c0_0, %c0_1] : memref<1x4x512xf32, #tpu.memory_space<vmem>>, vector<1x4x512xf32>
    %1 = vector.shape_cast %0 : vector<1x4x512xf32> to vector<4x512xf32>
    %c0_2 = arith.constant 0 : index
    %c0_3 = arith.constant 0 : index
    %2 = vector.load %arg2[%c0_2, %c0_3] : memref<4x1xf32, #tpu.memory_space<vmem>>, vector<4x1xf32>
    %3 = vector.broadcast %2 : vector<4x1xf32> to vector<4x512xf32>
    %4 = arith.mulf %1, %3 : vector<4x512xf32>
    %c0_4 = arith.constant 0 : index
    %c0_5 = arith.constant 0 : index
    %5 = vector.load %arg3[%c0_4, %c0_5] : memref<4x1xf32, #tpu.memory_space<vmem>>, vector<4x1xf32>
    %6 = vector.broadcast %5 : vector<4x1xf32> to vector<4x512xf32>
    %7 = arith.addf %4, %6 : vector<4x512xf32>
    %cst = arith.constant 0.000000e+00 : f32
    %8 = vector.broadcast %cst : f32 to vector<4x512xf32>
    %9 = arith.maximumf %7, %8 : vector<4x512xf32>
    %c0_6 = arith.constant 0 : index
    %c128 = arith.constant 128 : index
    %10 = vector.load %arg7[%c0_6, %c128] : memref<4x768xf32, #tpu.memory_space<vmem>>, vector<4x512xf32>
    tpu.vector_store %arg7[%c0_6, %c128], %9 {strides = array<i32>} : memref<4x768xf32, #tpu.memory_space<vmem>>, vector<4x512xf32>,
    %c0_7 = arith.constant 0 : index
    %c110 = arith.constant 110 : index
    %11 = vector.load %arg7[%c0_7, %c110] : memref<4x768xf32, #tpu.memory_space<vmem>>, vector<4x512xf32>
    %c0_8 = arith.constant 0 : index
    %c0_9 = arith.constant 0 : index
    %12 = vector.load %arg5[%c0_8, %c0_9] : memref<9x512xf32, #tpu.memory_space<vmem>>, vector<1x512xf32>
    %cst_10 = arith.constant 5.000000e-01 : f32
    %13 = vector.broadcast %cst_10 : f32 to vector<1x512xf32>
    %14 = arith.cmpf ogt, %12, %13 : vector<1x512xf32>
    %cst_11 = arith.constant 0.000000e+00 : f32
    %15 = vector.broadcast %cst_11 : f32 to vector<4x512xf32>
    %16 = vector.shape_cast %14 : vector<1x512xi1> to vector<1x512xi1>
    %17 = vector.broadcast %16 : vector<1x512xi1> to vector<4x512xi1>
    %18 = arith.select %17, %11, %15 : vector<4x512xi1>, vector<4x512xf32>
    %c0_12 = arith.constant 0 : index
    %c0_13 = arith.constant 0 : index
    %c0_14 = arith.constant 0 : index
    %19 = vector.load %arg4[%c0_12, %c0_13, %c0_14] : memref<9x8x4xf32, #tpu.memory_space<vmem>>, vector<1x8x4xf32>
    %20 = vector.shape_cast %19 : vector<1x8x4xf32> to vector<8x4xf32>
    %cst_15 = arith.constant dense<0.000000e+00> : vector<8x512xf32>
    %21 = tpu.matmul %20, %18, %cst_15 {dimension_numbers = #tpu.dot_dimension_numbers<[1], [0], [0], [1], [0, 0, 1, 1], [], []>} : vector<8x4xf32>, vector<4x512xf32>, vector<8x512xf32> -> vector<8x512xf32>
    %c0_16 = arith.constant 0 : index
    %c112 = arith.constant 112 : index
    %22 = vector.load %arg7[%c0_16, %c112] : memref<4x768xf32, #tpu.memory_space<vmem>>, vector<4x512xf32>
    %c1 = arith.constant 1 : index
    %c0_17 = arith.constant 0 : index
    %23 = vector.load %arg5[%c1, %c0_17] : memref<9x512xf32, #tpu.memory_space<vmem>>, vector<1x512xf32>
    %cst_18 = arith.constant 5.000000e-01 : f32
    %24 = vector.broadcast %cst_18 : f32 to vector<1x512xf32>
    %25 = arith.cmpf ogt, %23, %24 : vector<1x512xf32>
    %cst_19 = arith.constant 0.000000e+00 : f32
    %26 = vector.broadcast %cst_19 : f32 to vector<4x512xf32>
    %27 = vector.shape_cast %25 : vector<1x512xi1> to vector<1x512xi1>
    %28 = vector.broadcast %27 : vector<1x512xi1> to vector<4x512xi1>
    %29 = arith.select %28, %22, %26 : vector<4x512xi1>, vector<4x512xf32>
    %c1_20 = arith.constant 1 : index
    %c0_21 = arith.constant 0 : index
    %c0_22 = arith.constant 0 : index
    %30 = vector.load %arg4[%c1_20, %c0_21, %c0_22] : memref<9x8x4xf32, #tpu.memory_space<vmem>>, vector<1x8x4xf32>
    %31 = vector.shape_cast %30 : vector<1x8x4xf32> to vector<8x4xf32>
    %cst_23 = arith.constant dense<0.000000e+00> : vector<8x512xf32>
    %32 = tpu.matmul %31, %29, %cst_23 {dimension_numbers = #tpu.dot_dimension_numbers<[1], [0], [0], [1], [0, 0, 1, 1], [], []>} : vector<8x4xf32>, vector<4x512xf32>, vector<8x512xf32> -> vector<8x512xf32>
    %33 = arith.addf %21, %32 : vector<8x512xf32>
    %c0_24 = arith.constant 0 : index
    %c114 = arith.constant 114 : index
    %34 = vector.load %arg7[%c0_24, %c114] : memref<4x768xf32, #tpu.memory_space<vmem>>, vector<4x512xf32>
    %c2 = arith.constant 2 : index
    %c0_25 = arith.constant 0 : index
    %35 = vector.load %arg5[%c2, %c0_25] : memref<9x512xf32, #tpu.memory_space<vmem>>, vector<1x512xf32>
    %cst_26 = arith.constant 5.000000e-01 : f32
    %36 = vector.broadcast %cst_26 : f32 to vector<1x512xf32>
    %37 = arith.cmpf ogt, %35, %36 : vector<1x512xf32>
    %cst_27 = arith.constant 0.000000e+00 : f32
    %38 = vector.broadcast %cst_27 : f32 to vector<4x512xf32>
    %39 = vector.shape_cast %37 : vector<1x512xi1> to vector<1x512xi1>
    %40 = vector.broadcast %39 : vector<1x512xi1> to vector<4x512xi1>
    %41 = arith.select %40, %34, %38 : vector<4x512xi1>, vector<4x512xf32>
    %c2_28 = arith.constant 2 : index
    %c0_29 = arith.constant 0 : index
    %c0_30 = arith.constant 0 : index
    %42 = vector.load %arg4[%c2_28, %c0_29, %c0_30] : memref<9x8x4xf32, #tpu.memory_space<vmem>>, vector<1x8x4xf32>
    %43 = vector.shape_cast %42 : vector<1x8x4xf32> to vector<8x4xf32>
    %cst_31 = arith.constant dense<0.000000e+00> : vector<8x512xf32>
    %44 = tpu.matmul %43, %41, %cst_31 {dimension_numbers = #tpu.dot_dimension_numbers<[1], [0], [0], [1], [0, 0, 1, 1], [], []>} : vector<8x4xf32>, vector<4x512xf32>, vector<8x512xf32> -> vector<8x512xf32>
    %45 = arith.addf %33, %44 : vector<8x512xf32>
    %c0_32 = arith.constant 0 : index
    %c126 = arith.constant 126 : index
    %46 = vector.load %arg7[%c0_32, %c126] : memref<4x768xf32, #tpu.memory_space<vmem>>, vector<4x512xf32>
    %c3 = arith.constant 3 : index
    %c0_33 = arith.constant 0 : index
    %47 = vector.load %arg5[%c3, %c0_33] : memref<9x512xf32, #tpu.memory_space<vmem>>, vector<1x512xf32>
    %cst_34 = arith.constant 5.000000e-01 : f32
    %48 = vector.broadcast %cst_34 : f32 to vector<1x512xf32>
    %49 = arith.cmpf ogt, %47, %48 : vector<1x512xf32>
    %cst_35 = arith.constant 0.000000e+00 : f32
    %50 = vector.broadcast %cst_35 : f32 to vector<4x512xf32>
    %51 = vector.shape_cast %49 : vector<1x512xi1> to vector<1x512xi1>
    %52 = vector.broadcast %51 : vector<1x512xi1> to vector<4x512xi1>
    %53 = arith.select %52, %46, %50 : vector<4x512xi1>, vector<4x512xf32>
    %c3_36 = arith.constant 3 : index
    %c0_37 = arith.constant 0 : index
    %c0_38 = arith.constant 0 : index
    %54 = vector.load %arg4[%c3_36, %c0_37, %c0_38] : memref<9x8x4xf32, #tpu.memory_space<vmem>>, vector<1x8x4xf32>
    %55 = vector.shape_cast %54 : vector<1x8x4xf32> to vector<8x4xf32>
    %cst_39 = arith.constant dense<0.000000e+00> : vector<8x512xf32>
    %56 = tpu.matmul %55, %53, %cst_39 {dimension_numbers = #tpu.dot_dimension_numbers<[1], [0], [0], [1], [0, 0, 1, 1], [], []>} : vector<8x4xf32>, vector<4x512xf32>, vector<8x512xf32> -> vector<8x512xf32>
    %57 = arith.addf %45, %56 : vector<8x512xf32>
    %c0_40 = arith.constant 0 : index
    %c128_41 = arith.constant 128 : index
    %58 = vector.load %arg7[%c0_40, %c128_41] : memref<4x768xf32, #tpu.memory_space<vmem>>, vector<4x512xf32>
    %c4 = arith.constant 4 : index
    %c0_42 = arith.constant 0 : index
    %c0_43 = arith.constant 0 : index
    %59 = vector.load %arg4[%c4, %c0_42, %c0_43] : memref<9x8x4xf32, #tpu.memory_space<vmem>>, vector<1x8x4xf32>
    %60 = vector.shape_cast %59 : vector<1x8x4xf32> to vector<8x4xf32>
    %cst_44 = arith.constant dense<0.000000e+00> : vector<8x512xf32>
    %61 = tpu.matmul %60, %58, %cst_44 {dimension_numbers = #tpu.dot_dimension_numbers<[1], [0], [0], [1], [0, 0, 1, 1], [], []>} : vector<8x4xf32>, vector<4x512xf32>, vector<8x512xf32> -> vector<8x512xf32>
    %62 = arith.addf %57, %61 : vector<8x512xf32>
    %c0_45 = arith.constant 0 : index
    %c130 = arith.constant 130 : index
    %63 = vector.load %arg7[%c0_45, %c130] : memref<4x768xf32, #tpu.memory_space<vmem>>, vector<4x512xf32>
    %c5 = arith.constant 5 : index
    %c0_46 = arith.constant 0 : index
    %64 = vector.load %arg5[%c5, %c0_46] : memref<9x512xf32, #tpu.memory_space<vmem>>, vector<1x512xf32>
    %cst_47 = arith.constant 5.000000e-01 : f32
    %65 = vector.broadcast %cst_47 : f32 to vector<1x512xf32>
    %66 = arith.cmpf ogt, %64, %65 : vector<1x512xf32>
    %cst_48 = arith.constant 0.000000e+00 : f32
    %67 = vector.broadcast %cst_48 : f32 to vector<4x512xf32>
    %68 = vector.shape_cast %66 : vector<1x512xi1> to vector<1x512xi1>
    %69 = vector.broadcast %68 : vector<1x512xi1> to vector<4x512xi1>
    %70 = arith.select %69, %63, %67 : vector<4x512xi1>, vector<4x512xf32>
    %c5_49 = arith.constant 5 : index
    %c0_50 = arith.constant 0 : index
    %c0_51 = arith.constant 0 : index
    %71 = vector.load %arg4[%c5_49, %c0_50, %c0_51] : memref<9x8x4xf32, #tpu.memory_space<vmem>>, vector<1x8x4xf32>
    %72 = vector.shape_cast %71 : vector<1x8x4xf32> to vector<8x4xf32>
    %cst_52 = arith.constant dense<0.000000e+00> : vector<8x512xf32>
    %73 = tpu.matmul %72, %70, %cst_52 {dimension_numbers = #tpu.dot_dimension_numbers<[1], [0], [0], [1], [0, 0, 1, 1], [], []>} : vector<8x4xf32>, vector<4x512xf32>, vector<8x512xf32> -> vector<8x512xf32>
    %74 = arith.addf %62, %73 : vector<8x512xf32>
    %c0_53 = arith.constant 0 : index
    %c142 = arith.constant 142 : index
    %75 = vector.load %arg7[%c0_53, %c142] : memref<4x768xf32, #tpu.memory_space<vmem>>, vector<4x512xf32>
    %c6 = arith.constant 6 : index
    %c0_54 = arith.constant 0 : index
    %76 = vector.load %arg5[%c6, %c0_54] : memref<9x512xf32, #tpu.memory_space<vmem>>, vector<1x512xf32>
    %cst_55 = arith.constant 5.000000e-01 : f32
    %77 = vector.broadcast %cst_55 : f32 to vector<1x512xf32>
    %78 = arith.cmpf ogt, %76, %77 : vector<1x512xf32>
    %cst_56 = arith.constant 0.000000e+00 : f32
    %79 = vector.broadcast %cst_56 : f32 to vector<4x512xf32>
    %80 = vector.shape_cast %78 : vector<1x512xi1> to vector<1x512xi1>
    %81 = vector.broadcast %80 : vector<1x512xi1> to vector<4x512xi1>
    %82 = arith.select %81, %75, %79 : vector<4x512xi1>, vector<4x512xf32>
    %c6_57 = arith.constant 6 : index
    %c0_58 = arith.constant 0 : index
    %c0_59 = arith.constant 0 : index
    %83 = vector.load %arg4[%c6_57, %c0_58, %c0_59] : memref<9x8x4xf32, #tpu.memory_space<vmem>>, vector<1x8x4xf32>
    %84 = vector.shape_cast %83 : vector<1x8x4xf32> to vector<8x4xf32>
    %cst_60 = arith.constant dense<0.000000e+00> : vector<8x512xf32>
    %85 = tpu.matmul %84, %82, %cst_60 {dimension_numbers = #tpu.dot_dimension_numbers<[1], [0], [0], [1], [0, 0, 1, 1], [], []>} : vector<8x4xf32>, vector<4x512xf32>, vector<8x512xf32> -> vector<8x512xf32>
    %86 = arith.addf %74, %85 : vector<8x512xf32>
    %c0_61 = arith.constant 0 : index
    %c144 = arith.constant 144 : index
    %87 = vector.load %arg7[%c0_61, %c144] : memref<4x768xf32, #tpu.memory_space<vmem>>, vector<4x512xf32>
    %c7 = arith.constant 7 : index
    %c0_62 = arith.constant 0 : index
    %88 = vector.load %arg5[%c7, %c0_62] : memref<9x512xf32, #tpu.memory_space<vmem>>, vector<1x512xf32>
    %cst_63 = arith.constant 5.000000e-01 : f32
    %89 = vector.broadcast %cst_63 : f32 to vector<1x512xf32>
    %90 = arith.cmpf ogt, %88, %89 : vector<1x512xf32>
    %cst_64 = arith.constant 0.000000e+00 : f32
    %91 = vector.broadcast %cst_64 : f32 to vector<4x512xf32>
    %92 = vector.shape_cast %90 : vector<1x512xi1> to vector<1x512xi1>
    %93 = vector.broadcast %92 : vector<1x512xi1> to vector<4x512xi1>
    %94 = arith.select %93, %87, %91 : vector<4x512xi1>, vector<4x512xf32>
    %c7_65 = arith.constant 7 : index
    %c0_66 = arith.constant 0 : index
    %c0_67 = arith.constant 0 : index
    %95 = vector.load %arg4[%c7_65, %c0_66, %c0_67] : memref<9x8x4xf32, #tpu.memory_space<vmem>>, vector<1x8x4xf32>
    %96 = vector.shape_cast %95 : vector<1x8x4xf32> to vector<8x4xf32>
    %cst_68 = arith.constant dense<0.000000e+00> : vector<8x512xf32>
    %97 = tpu.matmul %96, %94, %cst_68 {dimension_numbers = #tpu.dot_dimension_numbers<[1], [0], [0], [1], [0, 0, 1, 1], [], []>} : vector<8x4xf32>, vector<4x512xf32>, vector<8x512xf32> -> vector<8x512xf32>
    %98 = arith.addf %86, %97 : vector<8x512xf32>
    %c0_69 = arith.constant 0 : index
    %c146 = arith.constant 146 : index
    %99 = vector.load %arg7[%c0_69, %c146] : memref<4x768xf32, #tpu.memory_space<vmem>>, vector<4x512xf32>
    %c8 = arith.constant 8 : index
    %c0_70 = arith.constant 0 : index
    %100 = vector.load %arg5[%c8, %c0_70] : memref<9x512xf32, #tpu.memory_space<vmem>>, vector<1x512xf32>
    %cst_71 = arith.constant 5.000000e-01 : f32
    %101 = vector.broadcast %cst_71 : f32 to vector<1x512xf32>
    %102 = arith.cmpf ogt, %100, %101 : vector<1x512xf32>
    %cst_72 = arith.constant 0.000000e+00 : f32
    %103 = vector.broadcast %cst_72 : f32 to vector<4x512xf32>
    %104 = vector.shape_cast %102 : vector<1x512xi1> to vector<1x512xi1>
    %105 = vector.broadcast %104 : vector<1x512xi1> to vector<4x512xi1>
    %106 = arith.select %105, %99, %103 : vector<4x512xi1>, vector<4x512xf32>
    %c8_73 = arith.constant 8 : index
    %c0_74 = arith.constant 0 : index
    %c0_75 = arith.constant 0 : index
    %107 = vector.load %arg4[%c8_73, %c0_74, %c0_75] : memref<9x8x4xf32, #tpu.memory_space<vmem>>, vector<1x8x4xf32>
    %108 = vector.shape_cast %107 : vector<1x8x4xf32> to vector<8x4xf32>
    %cst_76 = arith.constant dense<0.000000e+00> : vector<8x512xf32>
    %109 = tpu.matmul %108, %106, %cst_76 {dimension_numbers = #tpu.dot_dimension_numbers<[1], [0], [0], [1], [0, 0, 1, 1], [], []>} : vector<8x4xf32>, vector<4x512xf32>, vector<8x512xf32> -> vector<8x512xf32>
    %110 = arith.addf %98, %109 : vector<8x512xf32>
    %c0_77 = arith.constant 0 : index
    %c0_78 = arith.constant 0 : index
    %c0_79 = arith.constant 0 : index
    %111 = vector.load %arg6[%c0_77, %c0_78, %c0_79] : memref<1x8x512xf32, #tpu.memory_space<vmem>>, vector<1x8x512xf32>
    %112 = vector.shape_cast %111 : vector<1x8x512xf32> to vector<8x512xf32>
    %113 = vector.shape_cast %110 : vector<8x512xf32> to vector<1x8x512xf32>
    tpu.vector_store %arg6[%c0_77, %c0_78, %c0_79], %113 {strides = array<i32>} : memref<1x8x512xf32, #tpu.memory_space<vmem>>, vector<1x8x512xf32>,
    return
  }
  func.func @transform_0(%arg0: i32) -> (i32, i32, i32) {
    %c0_i32 = arith.constant 0 : i32
    %c0_i32_0 = arith.constant 0 : i32
    %c0_i32_1 = arith.constant 0 : i32
    return %arg0, %c0_i32, %c0_i32_0 : i32, i32, i32
  }
  func.func @transform_1(%arg0: i32) -> (i32, i32) {
    %c0_i32 = arith.constant 0 : i32
    %c0_i32_0 = arith.constant 0 : i32
    %c0_i32_1 = arith.constant 0 : i32
    return %c0_i32, %c0_i32_0 : i32, i32
  }
  func.func @transform_2(%arg0: i32) -> (i32, i32) {
    %c0_i32 = arith.constant 0 : i32
    %c0_i32_0 = arith.constant 0 : i32
    %c0_i32_1 = arith.constant 0 : i32
    return %c0_i32, %c0_i32_0 : i32, i32
  }
  func.func @transform_3(%arg0: i32) -> (i32, i32, i32) {
    %c0_i32 = arith.constant 0 : i32
    %c0_i32_0 = arith.constant 0 : i32
    %c0_i32_1 = arith.constant 0 : i32
    %c0_i32_2 = arith.constant 0 : i32
    return %c0_i32, %c0_i32_0, %c0_i32_1 : i32, i32, i32
  }
  func.func @transform_4(%arg0: i32) -> (i32, i32) {
    %c0_i32 = arith.constant 0 : i32
    %c0_i32_0 = arith.constant 0 : i32
    %c0_i32_1 = arith.constant 0 : i32
    return %c0_i32, %c0_i32_0 : i32, i32
  }
  func.func @transform_5(%arg0: i32) -> (i32, i32, i32) {
    %c0_i32 = arith.constant 0 : i32
    %c0_i32_0 = arith.constant 0 : i32
    %c0_i32_1 = arith.constant 0 : i32
    return %arg0, %c0_i32, %c0_i32_0 : i32, i32, i32
  }
}

</mosaic_0001>

<bundles_post_ra>
// kernel: tpu_custom_call.1
= control target key start
LH: loop header
LB: loop body
LE: loop exit
PB: predicated region body
PF: predicated region fallthrough
CT: control target
= control target key end

     0   :  { %10 = vsyncpa [#allocation4], 0  ;;  %s3111_s0 = inlined_call_operand.vmem [shape: f32[2,4,512], index: 0, kind: input, shape index: {}]   ;;  %s3112_s1 = inlined_call_operand.vmem [shape: f32[4,1], index: 1, kind: input, shape index: {}]   ;;  %s3113_s2 = inlined_call_operand.vmem [shape: f32[4,1], index: 2, kind: input, shape index: {}]   ;;  %s3114_s3 = inlined_call_operand.vmem [shape: f32[9,8,4], index: 3, kind: input, shape index: {}]   ;;  %s3115_s4 = inlined_call_operand.vmem [shape: f32[9,512], index: 4, kind: input, shape index: {}]   ;;  %s3116_s5 = inlined_call_operand.hbm [shape: f32[2,8,512], index: 5, kind: output, shape index: {}]  }
   0x1   :  { %12 = vsyncpa [#allocation4 + $0x1], 0  ;;  %s2470_s18 = smov 0   ;;  %s2472_s19 = smov 0  }
   0x2   :  { %s2474_s20 = smov 0   ;;  %s2476_s21 = smov 0  }
   0x3 LB: > { %s2491_s22 = sadd.s32 4294967295, %s2426_s21   ;;  %s2230_s23 = sadd.s32 4294967294, %s2426_s21   ;;  %s2426_s21 = sphi %s2476_s21, %s3182_s21   ;;  %s2422_s20 = sphi %s2474_s20, %s3181_s20   ;;  %s2418_s19 = sphi %s2472_s19, %s3180_s19   ;;  %s2414_s18 = sphi %s2470_s18, %s3179_s18  }
   0x4   : > { %s2495_s24 = sadd.s32 1, %s2426_s21   ;;  %s135_s25 = sadd.s32 1, %s2422_s20 }
   0x5   : > { %s132_s26 = ssub.s32 %s2426_s21, %s2495_s24  ;;  %p145_p0 = scmp.ne.s32.totalorder %s2422_s20, %s2418_s19 }
   0x6   : > { %p133_p1 = scmp.eq.s32.totalorder %s132_s26, 0  ;;  %p146_p2 = scmp.eq.s32.totalorder %s2491_s22, 1 }
   0x7   : > { %p151_p3 = scmp.ne.s32.totalorder %s2418_s19, %s2414_s18  ;;  %p152_p4 = scmp.eq.s32.totalorder %s2230_s23, 1 }
   0x8   : > { %s2506_s27 = scalar_select %p133_p1, %s2422_s20, %s135_s25  }
   0x9   : > { %p2508_p5 = por %p146_p2, %p145_p0  ;;  %p2512_p6 = por %p152_p4, %p151_p3 }
   0xa   : > { %p2233_p7 = scmp.ge.s32.totalorder %s2426_s21, 1  ;;  %p190_p8 = scmp.lt.s32.totalorder %s2426_s21, 3 }
   0xc   : > { %p191_p9 = pnand %p2233_p7, %p190_p8 }
   0xd   : > { %s2429_s9 = smov (!%p191_p9), 126   ;;  %s2430_s10 = smov (!%p191_p9), 114  }
   0xe   : > { %194 = sbr.rel (%p191_p9) target bundleno = 567 (0x237), region = 40  ;;  %p218_p10 = scmp.lt.s32.totalorder (!%p191_p9), %s2491_s22, 1 }
   0xf   : > { %s2432_s16 = smov (!%p191_p9), 16   ;;  %s2433_s17 = smov (!%p191_p9), 18  }
  0x10   : > { %s2434_s23 = smov (!%p191_p9), 14   ;;  %s2435_s25 = smov (!%p191_p9), 2  }
  0x11   : > { %s2437_s26 = smov (!%p191_p9), 112   ;;  %s2438_s30 = smov (!%p191_p9), 110  }
  0x12   : > { %s215_s8 = sand.u32 (!%p191_p9), 1, %s2418_s19  }
  0x13   : > { %v225_v0 = vld [vmem:[%s3112_s1] sm:$0xf]  ;;  %v2428_v1 = vmov 0   ;;  %v1282_v3 = vld [vmem:[#allocation2 + $0x14] sm:$0xf]  ;;  %v233_v7 = vlaneseq  ;;  %s219_s11 = scalar_select %p218_p10, %s2491_s22, 1 }
  0x14   : > { %2363 = vset.pattern.permute.xlu0 %v2428_v1  ;;  %v240_v2 = vld [vmem:[%s3113_s2] sm:$0xf]  ;;  %v1500_v4 = vld [vmem:[#allocation2 + $0x14] sm:$0xf]  ;;  %1320 = vrot.lane.b32.xlu1 %v1282_v3, %s2429_s9  ;;  %v2431_v5 = vmov 839922192  }
  0x15   : > { %228 = vperm.xlu0 %2363, %v225_v0   ;;  %v231_v6 = vunpack.c.l.s4 %v2431_v5  ;;  %v2529_v9 = vshrl.u32 %v233_v7, 7  ;;  %s2311_s12 = sshll.u32 %s219_s11, 4  ;;  %v2436_v28 = vmov 0.0   ;;  %v1718_v32 = vld [vmem:[#allocation2 + $0x14] sm:$0xf]  ;;  %vm348_vm2 = vcmask 130048  }
  0x16   : > { %s222_s15 = scalar_lea.vmem %s3111_s0, %s2311_s12  ;;  %444 = vmatprep.mubr.f32.mxu0 %v2436_v28  ;;  %515 = vmatprep.mubr.f32.mxu1 %v2436_v28  ;;  %v1936_v34 = vld [vmem:[#allocation2 + $0x14] sm:$0xf]  ;;  %v2237_v47 = vld [vmem:[%s3115_s4 + $0x1] ss:$8 sm:$0xf]  ;;  %vm367_vm6 = vcmask 1043456  }
  0x17   : > { %v232_v8 = vunpack.c.0.s8 %v231_v6  ;;  %v223_v13 = vld [vmem:[%s222_s15] sm:$0xff]  ;;  %v224_v14 = vld [vmem:[%s222_s15 + $0x8] sm:$0xff]  ;;  %vm316_vm0 = vcmp.gt.f32.partialorder %v2237_v47, 0.5  ;;  %v2611_v50 = vsub.s32 3, %v2529_v9  ;;  %v2614_v51 = vsub.s32 2, %v2529_v9 }
  0x18   : > { %v317_v52 = vsel %vm316_vm0, 1, %v2428_v1  ;;  %v262_v55 = vld [vmem:[%s3115_s4] ss:$8 sm:$0xf]  ;;  %v2626_v57 = vsub.s32 0, %v2529_v9  ;;  %v2629_v58 = vsub.s32 1, %v2529_v9 }
  0x19   : > { %243 = vperm.xlu0 %2363, %v240_v2   ;;  %v235_v10 = vsub.s32 %v232_v8, %v2529_v9  ;;  %v333_v56 = vrot.slane %v317_v52, %v2611_v50  ;;  %v329_v59 = vrot.slane %v317_v52, %v2614_v51  ;;  %v2251_v60 = vld [vmem:[%s3115_s4 + $0x2] ss:$8 sm:$0xf]  ;;  %vm263_vm1 = vcmp.gt.f32.partialorder %v262_v55, 0.5 }
  0x1a   : > { %vm684_vm4 = vcmp.gt.f32.partialorder %v2251_v60, 0.5  ;;  %v325_v2 = vrot.slane %v317_v52, %v2629_v58  ;;  %v321_v3 = vrot.slane %v317_v52, %v2626_v57  ;;  %v2259_v7 = vld [vmem:[%s3115_s4 + $0x3] ss:$8 sm:$0xf]  ;;  %vm363_vm10 = vcmask 31744  }
  0x1b   : > { %vm2639_vm3 = vcmp.eq.s32.totalorder %v333_v56, 1  ;;  %vm2643_vm5 = vcmp.eq.s32.totalorder %v329_v59, 1  ;;  %vm902_vm9 = vcmp.gt.f32.partialorder %v2259_v7, 0.5  ;;  %vm721_vm11 = vcmask 113664  }
  0x1c   : > { %vm2664_vm7 = vcmp.eq.s32.totalorder %v325_v2, 1  ;;  %vm2668_vm8 = vcmp.eq.s32.totalorder %v321_v3, 1  ;;  %vm300_vm12 = vcmask 146432  }
  0x1d   : > { %1538 = vrot.lane.b32.xlu0 %v1500_v4, %s2430_s10  ;;  %v264_v4 = vsel %vm263_vm1, 1, %v2428_v1 }
  0x86   : > { %v2585_v35 = vpop.permute.xlu1 %1320 }
  0x90   : > { %v229_v11 = vpop.permute.xlu0 %228 }
  0x91   : > { %v236_v12 = vrot.slane %v229_v11, %v235_v10 }
  0x93   : > { %v238_v16 = vmul.f32 %v236_v12, %v223_v13  ;;  %v239_v17 = vmul.f32 %v236_v12, %v224_v14  ;;  %v268_v13 = vrot.slane %v264_v4, %v2626_v57 }
  0x94   : > { %v244_v15 = vpop.permute.xlu0 %243 }
  0x95   : > { %v251_v18 = vrot.slane %v244_v15, %v235_v10  ;;  %v685_v10 = vsel %vm684_vm4, 1, %v2428_v1  ;;  %vm2689_vm13 = vcmp.eq.s32.totalorder %v268_v13, 1 }
  0x96   : > { %v697_v52 = vrot.slane %v685_v10, %v2614_v51  ;;  %v701_v55 = vrot.slane %v685_v10, %v2611_v50 }
  0x97   : > { %v253_v19 = vadd.f32 %v251_v18, %v238_v16  ;;  %v254_v20 = vadd.f32 %v251_v18, %v239_v17  ;;  %v272_v16 = vrot.slane %v264_v4, %v2629_v58  ;;  %v689_v17 = vrot.slane %v685_v10, %v2626_v57 }
  0x98   : > { %v2587_v36 = vpop.permute.xlu0 %1538  ;;  %v693_v18 = vrot.slane %v685_v10, %v2629_v58  ;;  %vm2752_vm4 = vcmp.eq.s32.totalorder %v697_v52, 1 }
  0x99   : > { %v2535_v21 = vmax.f32 %v253_v19, 0.0  ;;  %v2537_v22 = vmax.f32 %v254_v20, 0.0  ;;  %vm2699_vm14 = vcmp.eq.s32.totalorder %v272_v16, 1  ;;  %vm2705_vm0 = vcmp.eq.s32.totalorder %v689_v17, 1 }
  0x9a   : > { %vm2709_vm1 = vcmp.eq.s32.totalorder %v693_v18, 1 }
  0x9b   : > { %257 = vst [vmem:[#allocation2 + $0x4] sm:$0xff] %v2535_v21  ;;  %258 = vst [vmem:[#allocation2 + $0xc] sm:$0xff] %v2537_v22  ;;  %v2566_v31 = vcombine.high %v2535_v21, %v2535_v21  ;;  %v2572_v33 = vcombine.high %v2537_v22, %v2537_v22 }
  0xa2   : > { %v260_v23 = vld [vmem:[#allocation2 + $0x8] sm:$0xff]  ;;  %v259_v24 = vld [vmem:[#allocation2] sm:$0xff]  ;;  %v261_v25 = vld [vmem:[#allocation2 + $0x10] sm:$0xf] }
  0xa3   : > { %342 = vrot.lane.b32.xlu1 %v260_v23, %s2432_s16  ;;  %338 = vrot.lane.b32.xlu0 %v259_v24, %s2432_s16  ;;  %v681_v26 = vld [vmem:[#allocation2 + $0x10] sm:$0xf]  ;;  %v710_v29 = vcombine.high %v260_v23, %v260_v23  ;;  %v709_v30 = vcombine.high %v259_v24, %v259_v24 }
  0xa4   : > { %v899_v27 = vld [vmem:[#allocation2 + $0x10] sm:$0xf] }
  0xa7   : > { %346 = vrot.lane.b32.xlu1 %v261_v25, %s2432_s16  ;;  %294 = vrot.lane.b32.xlu0 %v260_v23, %s2433_s17 }
  0xab   : > { %290 = vrot.lane.b32.xlu1 %v259_v24, %s2433_s17  ;;  %298 = vrot.lane.b32.xlu0 %v261_v25, %s2433_s17 }
  0xaf   : > { %715 = vrot.lane.b32.xlu1 %v260_v23, %s2434_s23  ;;  %711 = vrot.lane.b32.xlu0 %v259_v24, %s2434_s23 }
  0xb3   : > { %719 = vrot.lane.b32.xlu1 %v681_v26, %s2434_s23  ;;  %933 = vrot.lane.b32.xlu0 %v260_v23, %s2435_s25  ;;  %v2238_v23 = vld [vmem:[%s3114_s3 + $0x8] sm:$0xff] }
  0xb7   : > { %929 = vrot.lane.b32.xlu1 %v259_v24, %s2435_s25  ;;  %937 = vrot.lane.b32.xlu0 %v899_v27, %s2435_s25  ;;  %v2274_v24 = vld [vmem:[%s3115_s4 + $0x5] ss:$8 sm:$0xf] }
  0xb8   : > { %vm1285_vm15 = vcmp.gt.f32.partialorder %v2274_v24, 0.5  ;;  %v2252_v24 = vld [vmem:[%s3114_s3 + $0x10] sm:$0xff] }
  0xb9   : > { %v2737_v7 = vsel %vm1285_vm15, 1, %v2428_v1 }
  0xba   : > { %v1294_v18 = vrot.slane %v2737_v7, %v2629_v58 }
  0xbb   : > { %1316 = vrot.lane.b32.xlu1 %v2537_v22, %s2429_s9  ;;  %1312 = vrot.lane.b32.xlu0 %v2535_v21, %s2429_s9 }
  0xbf   : > { %1530 = vrot.lane.b32.xlu1 %v2535_v21, %s2430_s10  ;;  %1534 = vrot.lane.b32.xlu0 %v2537_v22, %s2430_s10 }
  0xc3   : > { %1752 = vrot.lane.b32.xlu1 %v2537_v22, %s2437_s26  ;;  %344 = vrot.lane.b32.xlu0 %v710_v29, %s2432_s16 }
  0xc7   : > { %713 = vrot.lane.b32.xlu0 %v709_v30, %s2434_s23  ;;  %340 = vrot.lane.b32.xlu1 %v709_v30, %s2432_s16  ;;  %s2157_s16 = scalar_lea.sflag [#allocation4], %s215_s8 }
  0xcb   : > { %717 = vrot.lane.b32.xlu0 %v710_v29, %s2434_s23  ;;  %292 = vrot.lane.b32.xlu1 %v709_v30, %s2433_s17 }
  0xcf   : > { %1748 = vrot.lane.b32.xlu0 %v2535_v21, %s2437_s26  ;;  %296 = vrot.lane.b32.xlu1 %v710_v29, %s2433_s17  ;;  %s2439_s17 = smov [#allocation3]  }
  0xd0   : > { %s2370_s23 = sshll.u32 %s2439_s17, 4  ;;  %s2371_s23 = int_to_ptr.vmem [resolvable:$false] %s2370_s23 }
  0xd3   : > { %1970 = vrot.lane.b32.xlu0 %v2537_v22, %s2438_s30  ;;  %931 = vrot.lane.b32.xlu1 %v709_v30, %s2435_s25 }
  0xd7   : > { %1314 = vrot.lane.b32.xlu0 %v2566_v31, %s2429_s9  ;;  %935 = vrot.lane.b32.xlu1 %v710_v29, %s2435_s25  ;;  %s2372_s25 = scalar_lea.vmem %s2371_s23, 1024 }
  0xdb   : > { %1318 = vrot.lane.b32.xlu0 %v2572_v33, %s2429_s9  ;;  %1756 = vrot.lane.b32.xlu1 %v1718_v32, %s2437_s26  ;;  %v2696_v32 = vsel %vm902_vm9, 1, %v2428_v1  ;;  %s2234_s9 = sshll.u32 %s215_s8, 5 }
  0xdc   : > { %v907_v2 = vrot.slane %v2696_v32, %v2626_v57  ;;  %s217_s11 = scalar_lea.vmem [#allocation3], %s2234_s9 }
  0xdd   : > { %s2171_s12 = sshll.u32 %s217_s11, 4  ;;  %s2172_s12 = int_to_ptr.vmem [resolvable:$true] %s2171_s12 }
  0xde   : > { %p2373_p0 = scmp.lt.s32.totalorder %s2172_s12, %s2371_s23 }
  0xdf   : > { %1750 = vrot.lane.b32.xlu0 %v2566_v31, %s2437_s26  ;;  %1532 = vrot.lane.b32.xlu1 %v2566_v31, %s2430_s10 }
  0xe3   : > { %1754 = vrot.lane.b32.xlu0 %v2572_v33, %s2437_s26  ;;  %1536 = vrot.lane.b32.xlu1 %v2572_v33, %s2430_s10  ;;  %s2312_s10 = sshll.u32 %s2491_s22, 9  ;;  %s2366_s22 = scalar_lea.vmem %s2172_s12, 512 }
  0xe4   : > { %s2169_s15 = scalar_lea.hbm %s3116_s5, %s2312_s10  ;;  %p2367_p11 = scmp.ne.s32.totalorder %s2172_s12, %s2366_s22 }
  0xe5   : > { %p2374_p1 = scmp.lt.s32.totalorder %s2372_s25, %s2366_s22 }
  0xe6   : > { %p2368_p12 = pnand %p2367_p11, %p2508_p5 }
  0xe7   : > { %1968 = vrot.lane.b32.xlu1 %v2566_v31, %s2438_s30  ;;  %1974 = vrot.lane.b32.xlu0 %v1936_v34, %s2438_s30  ;;  %v1290_v34 = vrot.slane %v2737_v7, %v2626_v57  ;;  %p2375_p2 = por %p2374_p1, %p2373_p0 }
  0xe8   : > { %p2369_p13 = pneg %p2368_p12 }
  0xea   : > { %p2376_p3 = pnand %p2375_p2, %p2369_p13 }
  0xeb   : > { %1972 = vrot.lane.b32.xlu1 %v2572_v33, %s2438_s30 }
  0xef   : > { %1966 = vrot.lane.b32.xlu1 %v2535_v21, %s2438_s30 }
 0x115   : > { %v343_v37 = vpop.permute.xlu1 %342  ;;  %v339_v38 = vpop.permute.xlu0 %338 }
 0x119   : > { %v347_v39 = vpop.permute.xlu1 %346  ;;  %v2589_v40 = vpop.permute.xlu0 %294 }
 0x11d   : > { %v2591_v41 = vpop.permute.xlu1 %290  ;;  %v2593_v42 = vpop.permute.xlu0 %298 }
 0x121   : > { %v2595_v43 = vpop.permute.xlu1 %715  ;;  %v2597_v44 = vpop.permute.xlu0 %711 }
 0x125   : > { %v2599_v45 = vpop.permute.xlu1 %719  ;;  %v2601_v46 = vpop.permute.xlu0 %933 }
 0x129   : > { %v2606_v48 = vpop.permute.xlu1 %929  ;;  %v2608_v49 = vpop.permute.xlu0 %937 }
 0x12d   : > { %v2617_v53 = vpop.permute.xlu1 %1316  ;;  %v2619_v54 = vpop.permute.xlu0 %1312 }
 0x131   : > { %v2635_v61 = vpop.permute.xlu1 %1530  ;;  %v2637_v62 = vpop.permute.xlu0 %1534 }
 0x135   : > { %v2650_v5 = vpop.permute.xlu1 %1752  ;;  %v345_v6 = vpop.permute.xlu0 %344 }
 0x136   : > { %v351_v8 = vsel %vm348_vm2, %v343_v37, %v345_v6  ;;  %v352_v9 = vsel %vm348_vm2, %v345_v6, %v347_v39 }
 0x137   : > { %v360_v11 = vsel %vm2639_vm3, %v352_v9, 0.0  ;;  %v359_v12 = vsel %vm2643_vm5, %v351_v8, 0.0  ;;  %v911_v9 = vrot.slane %v2696_v32, %v2629_v58  ;;  %vm2756_vm5 = vcmp.eq.s32.totalorder %v701_v55, 1  ;;  %v2298_v8 = vld [vmem:[%s3115_s4 + $0x20] ss:$8 sm:$0xf] }
 0x138   : > { %2242 = vmatprep.subr.msk.mxu1 %vm367_vm6, %v360_v11 }
 0x139   : > { %2243 = vmatpush1.msk.msra.mxu1 %vm367_vm6, %v359_v12  ;;  %v714_v19 = vpop.permute.xlu0 %713  ;;  %v341_v20 = vpop.permute.xlu1 %340  ;;  %vm2794_vm9 = vcmp.eq.s32.totalorder %v911_v9, 1 }
 0x13a   : > { %v349_v25 = vsel %vm348_vm2, %v339_v38, %v341_v20  ;;  %v350_v26 = vsel %vm348_vm2, %v341_v20, %v343_v37  ;;  %2244 = vmatmul.mubr.msk.f32.vlgmr.msra.gmra.mxu1 %vm363_vm10, %v2238_v23  ;;  %v276_v37 = vrot.slane %v264_v4, %v2614_v51  ;;  %v280_v38 = vrot.slane %v264_v4, %v2611_v50 }
 0x13b   : > { %v358_v27 = vsel %vm2664_vm7, %v350_v26, 0.0  ;;  %v357_v29 = vsel %vm2668_vm8, %v349_v25, 0.0  ;;  %672 = vmatprep.mubr.f32.mxu1 %v2436_v28  ;;  %v723_v60 = vsel %vm721_vm11, %v714_v19, %v2595_v43  ;;  %v722_v3 = vsel %vm721_vm11, %v2597_v44, %v714_v19  ;;  %v2282_v19 = vld [vmem:[%s3115_s4 + $0x6] ss:$8 sm:$0xf] }
 0x13c   : > { %2239 = vmatprep.subr.msk.mxu0 %vm367_vm6, %v358_v27  ;;  %vm2740_vm2 = vcmp.eq.s32.totalorder %v276_v37, 1  ;;  %vm2744_vm3 = vcmp.eq.s32.totalorder %v280_v38, 1  ;;  %v731_v10 = vsel %vm2709_vm1, %v723_v60, 0.0  ;;  %vm939_vm7 = vcmask 15360  }
 0x13d   : > { %v718_v56 = vpop.permute.xlu0 %717  ;;  %2240 = vmatpush1.msk.msra.mxu0 %vm367_vm6, %v357_v29  ;;  %v293_v59 = vpop.permute.xlu1 %292  ;;  %v730_v15 = vsel %vm2705_vm0, %v722_v3, 0.0  ;;  %vm2784_vm8 = vcmp.eq.s32.totalorder %v907_v2, 1  ;;  %v915_v26 = vrot.slane %v2696_v32, %v2614_v51  ;;  %v919_v27 = vrot.slane %v2696_v32, %v2611_v50  ;;  %v2290_v29 = vld [vmem:[%s3115_s4 + $0x7] ss:$8 sm:$0xf] }
 0x13e   : > { %v301_v63 = vsel %vm300_vm12, %v2591_v41, %v293_v59  ;;  %v302_v0 = vsel %vm300_vm12, %v293_v59, %v2589_v40  ;;  %2241 = vmatmul.mubr.msk.f32.vlgmr.msra.gmra.mxu0 %vm363_vm10, %v2238_v23  ;;  %v313_v41 = vld [vmem:[%s3114_s3] sm:$0xff]  ;;  %v725_v20 = vsel %vm721_vm11, %v718_v56, %v2599_v45  ;;  %v724_v45 = vsel %vm721_vm11, %v2595_v43, %v718_v56  ;;  %v2260_v59 = vld [vmem:[%s3114_s3 + $0x18] sm:$0xff] }
 0x13f   : > { %v309_v4 = vsel %vm2689_vm13, %v301_v63, 0.0  ;;  %v310_v6 = vsel %vm2699_vm14, %v302_v0, 0.0  ;;  %601 = vmatprep.mubr.f32.mxu0 %v2436_v28  ;;  %vm1322_vm11 = vcmask 1031168   ;;  %v733_v37 = vsel %vm2756_vm5, %v725_v20, 0.0 }
 0x140   : > { %2245 = vmatprep.subr.msk.mxu0 %vm367_vm6, %v310_v6  ;;  %vm2818_vm13 = vcmp.eq.s32.totalorder %v1294_v18, 1  ;;  %v732_v47 = vsel %vm2752_vm4, %v724_v45, 0.0  ;;  %vm1721_vm14 = vcmp.gt.f32.partialorder %v2290_v29, 0.5  ;;  %vm2832_vm15 = vcmp.eq.s32.totalorder %v915_v26, 1 }
 0x141   : > { %v2760_v13 = vpop.permute.xlu0 %1748  ;;  %2246 = vmatpush1.msk.msra.mxu0 %vm367_vm6, %v309_v4  ;;  %v297_v14 = vpop.permute.xlu1 %296  ;;  %vm2836_vm0 = vcmp.eq.s32.totalorder %v919_v27, 1  ;;  %v1302_v60 = vrot.slane %v2737_v7, %v2611_v50  ;;  %v1298_v3 = vrot.slane %v2737_v7, %v2614_v51  ;;  %v2862_v44 = vsel %vm1721_vm14, 1, %v2428_v1 }
 0x142   : > { %v303_v16 = vsel %vm300_vm12, %v2589_v40, %v297_v14  ;;  %v304_v17 = vsel %vm300_vm12, %v297_v14, %v2593_v42  ;;  %2247 = vmatmul.mubr.msk.f32.vlgmr.msra.gmra.mxu0 %vm363_vm10, %v313_v41  ;;  %2253 = vmatprep.subr.msk.mxu0 %vm367_vm6, %v731_v10  ;;  %vm1503_vm12 = vcmp.gt.f32.partialorder %v2282_v19, 0.5  ;;  %vm2878_vm1 = vcmp.eq.s32.totalorder %v1290_v34, 1 }
 0x143   : > { %v311_v40 = vsel %vm2740_vm2, %v303_v16, 0.0  ;;  %v312_v42 = vsel %vm2744_vm3, %v304_v17, 0.0  ;;  %2254 = vmatpush1.msk.msra.mxu0 %vm367_vm6, %v730_v15  ;;  %815 = vmatprep.mubr.f32.mxu0 %v2436_v28  ;;  %v2847_v63 = vsel %vm1503_vm12, 1, %v2428_v1  ;;  %vm2887_vm2 = vcmp.eq.s32.totalorder %v1302_v60, 1 }
 0x144   : > { %2248 = vmatprep.subr.msk.mxu1 %vm367_vm6, %v312_v42  ;;  %vm1939_vm3 = vcmp.gt.f32.partialorder %v2298_v8, 0.5  ;;  %vm2900_vm4 = vcmp.eq.s32.totalorder %v1298_v3, 1  ;;  %v1730_v17 = vrot.slane %v2862_v44, %v2629_v58  ;;  %v1516_v42 = vrot.slane %v2847_v63, %v2614_v51  ;;  %v2291_v3 = vld [vmem:[%s3114_s3 + $0x38] sm:$0xff] }
 0x145   : > { %v2805_v30 = vpop.permute.xlu0 %1970  ;;  %2249 = vmatpush1.msk.msra.mxu1 %vm367_vm6, %v311_v40  ;;  %v932_v43 = vpop.permute.xlu1 %931  ;;  %v2275_v40 = vld [vmem:[%s3114_s3 + $0x28] sm:$0xff]  ;;  %v1520_v23 = vrot.slane %v2847_v63, %v2611_v50  ;;  %v1738_v26 = vrot.slane %v2862_v44, %v2611_v50 }
 0x146   : > { %v940_v32 = vsel %vm939_vm7, %v2606_v48, %v932_v43  ;;  %v941_v38 = vsel %vm939_vm7, %v932_v43, %v2601_v46  ;;  %2250 = vmatmul.mubr.msk.f32.vlgmr.msra.gmra.mxu1 %vm363_vm10, %v313_v41  ;;  %2255 = vmatmul.mubr.msk.f32.vlgmr.msra.gmra.mxu0 %vm363_vm10, %v2252_v24  ;;  %vm2971_vm12 = vcmp.eq.s32.totalorder %v1516_v42, 1 }
 0x147   : > { %v948_v52 = vsel %vm2784_vm8, %v940_v32, 0.0  ;;  %v949_v48 = vsel %vm2794_vm9, %v941_v38, 0.0  ;;  %2256 = vmatprep.subr.msk.mxu1 %vm367_vm6, %v733_v37  ;;  %886 = vmatprep.mubr.f32.mxu1 %v2436_v28  ;;  %vm1758_vm8 = vcmask 916480  }
 0x148   : > { %2257 = vmatpush1.msk.msra.mxu1 %vm367_vm6, %v732_v47  ;;  %2261 = vmatprep.subr.msk.mxu0 %vm367_vm6, %v949_v48 }
 0x149   : > { %v1315_v0 = vpop.permute.xlu0 %1314  ;;  %2262 = vmatpush1.msk.msra.mxu0 %vm367_vm6, %v948_v52  ;;  %1033 = vmatprep.mubr.f32.mxu0 %v2436_v28  ;;  %v936_v2 = vpop.permute.xlu1 %935  ;;  %v1734_v52 = vrot.slane %v2862_v44, %v2614_v51 }
 0x14a   : > { %v1324_v4 = vsel %vm1322_vm11, %v1315_v0, %v2617_v53  ;;  %v942_v6 = vsel %vm939_vm7, %v2601_v46, %v936_v2  ;;  %v943_v41 = vsel %vm939_vm7, %v936_v2, %v2608_v49  ;;  %2258 = vmatmul.mubr.msk.f32.vlgmr.msra.gmra.mxu1 %vm363_vm10, %v2252_v24  ;;  %2263 = vmatmul.mubr.msk.f32.vlgmr.msra.gmra.mxu0 %vm363_vm10, %v2260_v59  ;;  %vm1540_vm7 = vcmask 932864  }
 0x14b   : > { %v1332_v7 = vsel %vm2818_vm13, %v1324_v4, 0.0  ;;  %v950_v9 = vsel %vm2832_vm15, %v942_v6, 0.0  ;;  %v951_v46 = vsel %vm2836_vm0, %v943_v41, 0.0  ;;  %2268 = vmatprep.subr.msk.mxu0 %vm367_vm6, %v2566_v31  ;;  %v1508_v49 = vrot.slane %v2847_v63, %v2626_v57  ;;  %v2267_v31 = vld [vmem:[%s3114_s3 + $0x20] sm:$0xff]  ;;  %1104 = vmatprep.mubr.f32.mxu1 %v2436_v28 }
 0x14c   : > { %v1323_v11 = vsel %vm1322_vm11, %v2619_v54, %v1315_v0  ;;  %2269 = vmatpush1.msk.msra.mxu0 %vm367_vm6, %v2535_v21  ;;  %2264 = vmatprep.subr.msk.mxu1 %vm367_vm6, %v951_v46  ;;  %v1512_v21 = vrot.slane %v2847_v63, %v2629_v58  ;;  %v2934_v24 = vsel %vm1939_vm3, 1, %v2428_v1  ;;  %vm2975_vm13 = vcmp.eq.s32.totalorder %v1520_v23, 1 }
 0x14d   : > { %2276 = vmatprep.subr.msk.mxu0 %vm367_vm6, %v1332_v7  ;;  %v1319_v14 = vpop.permute.xlu0 %1318  ;;  %2265 = vmatpush1.msk.msra.mxu1 %vm367_vm6, %v950_v9  ;;  %v2896_v15 = vpop.permute.xlu1 %1756  ;;  %v1331_v18 = vsel %vm2878_vm1, %v1323_v11, 0.0  ;;  %vm2916_vm5 = vcmp.eq.s32.totalorder %v1508_v49, 1  ;;  %v1948_v34 = vrot.slane %v2934_v24, %v2629_v58  ;;  %v2283_v58 = vld [vmem:[%s3114_s3 + $0x30] sm:$0xff]  ;;  %vm2992_vm15 = vcmp.eq.s32.totalorder %v1738_v26, 1 }
 0x14e   : > { %v1326_v16 = vsel %vm1322_vm11, %v1319_v14, %v2585_v35  ;;  %1198 = vmatprep.mubr.f32.mxu0 %v2436_v28  ;;  %2266 = vmatmul.mubr.msk.f32.vlgmr.msra.gmra.mxu1 %vm363_vm10, %v2260_v59  ;;  %v1325_v35 = vsel %vm1322_vm11, %v2617_v53, %v1319_v14  ;;  %vm2941_vm9 = vcmp.eq.s32.totalorder %v1512_v21, 1  ;;  %vm2946_vm11 = vcmp.eq.s32.totalorder %v1730_v17, 1 }
 0x14f   : > { %v1334_v19 = vsel %vm2887_vm2, %v1326_v16, 0.0  ;;  %2270 = vmatmul.mubr.msk.f32.vlgmr.msra.gmra.mxu0 %vm363_vm10, %v2267_v31  ;;  %2271 = vmatprep.subr.msk.mxu1 %vm367_vm6, %v2572_v33  ;;  %v1726_v33 = vrot.slane %v2862_v44, %v2626_v57  ;;  %v1333_v27 = vsel %vm2900_vm4, %v1325_v35, 0.0  ;;  %vm1976_vm0 = vcmask 900096  }
 0x150   : > { %2277 = vmatpush1.msk.msra.mxu0 %vm367_vm6, %v1331_v18  ;;  %2272 = vmatpush1.msk.msra.mxu1 %vm367_vm6, %v2537_v22  ;;  %vm3009_vm1 = vcmp.eq.s32.totalorder %v1948_v34, 1  ;;  %v1952_v4 = vrot.slane %v2934_v24, %v2614_v51  ;;  %v1956_v6 = vrot.slane %v2934_v24, %v2611_v50  ;;  %vm3026_vm2 = vcmp.eq.s32.totalorder %v1734_v52, 1 }
 0x151   : > { %v1751_v53 = vpop.permute.xlu0 %1750  ;;  %1269 = vmatprep.mubr.f32.mxu1 %v2436_v28  ;;  %v1533_v25 = vpop.permute.xlu1 %1532  ;;  %2279 = vmatprep.subr.msk.mxu1 %vm367_vm6, %v1334_v19  ;;  %vm2982_vm14 = vcmp.eq.s32.totalorder %v1726_v33, 1  ;;  %v1944_v49 = vrot.slane %v2934_v24, %v2626_v57  ;;  %v2299_v57 = vld [vmem:[%s3114_s3 + $0x40] sm:$0xff] }
 0x152   : > { %1416 = vmatprep.mubr.f32.mxu0 %v2436_v28  ;;  %v1541_v22 = vsel %vm1540_vm7, %v2635_v61, %v1533_v25  ;;  %v1542_v29 = vsel %vm1540_vm7, %v1533_v25, %v2637_v62  ;;  %2273 = vmatmul.mubr.msk.f32.vlgmr.msra.gmra.mxu1 %vm363_vm10, %v2267_v31  ;;  %v1760_v61 = vsel %vm1758_vm8, %v1751_v53, %v2650_v5  ;;  %vm3048_vm3 = vcmp.eq.s32.totalorder %v1952_v4, 1 }
 0x153   : > { %v1549_v43 = vsel %vm2916_vm5, %v1541_v22, 0.0  ;;  %2278 = vmatmul.mubr.msk.f32.vlgmr.msra.gmra.mxu0 %vm363_vm10, %v2275_v40  ;;  %v1550_v37 = vsel %vm2941_vm9, %v1542_v29, 0.0  ;;  %2280 = vmatpush1.msk.msra.mxu1 %vm367_vm6, %v1333_v27  ;;  %v1759_v47 = vsel %vm1758_vm8, %v2760_v13, %v1751_v53  ;;  %v1768_v60 = vsel %vm2946_vm11, %v1760_v61, 0.0 }
 0x154   : > { %1487 = vmatprep.mubr.f32.mxu1 %v2436_v28  ;;  %2284 = vmatprep.subr.msk.mxu0 %vm367_vm6, %v1550_v37  ;;  %vm1960_vm4 = vcmp.eq.s32.totalorder %v1956_v6, 1  ;;  %vm1957_vm5 = vcmp.eq.s32.totalorder %v1944_v49, 1 }
 0x155   : > { %v1755_v48 = vpop.permute.xlu0 %1754  ;;  %1634 = vmatprep.mubr.f32.mxu0 %v2436_v28  ;;  %v1537_v55 = vpop.permute.xlu1 %1536  ;;  %2285 = vmatpush1.msk.msra.mxu0 %vm367_vm6, %v1549_v43 }
 0x156   : > { %v1543_v59 = vsel %vm1540_vm7, %v2637_v62, %v1537_v55  ;;  %v1544_v13 = vsel %vm1540_vm7, %v1537_v55, %v2587_v36  ;;  %2281 = vmatmul.mubr.msk.f32.vlgmr.msra.gmra.mxu1 %vm363_vm10, %v2275_v40  ;;  %v1767_v36 = vsel %vm2982_vm14, %v1759_v47, 0.0  ;;  %v1762_v62 = vsel %vm1758_vm8, %v1755_v48, %v2896_v15  ;;  %2292 = vmatprep.subr.msk.mxu0 %vm367_vm6, %v1768_v60 }
 0x157   : > { %v1551_v63 = vsel %vm2971_vm12, %v1543_v59, 0.0  ;;  %v1552_v0 = vsel %vm2975_vm13, %v1544_v13, 0.0  ;;  %2286 = vmatmul.mubr.msk.f32.vlgmr.msra.gmra.mxu0 %vm363_vm10, %v2283_v58  ;;  %v1761_v44 = vsel %vm1758_vm8, %v2650_v5, %v1755_v48  ;;  %1705 = vmatprep.mubr.f32.mxu1 %v2436_v28  ;;  %v1770_v50 = vsel %vm2992_vm15, %v1762_v62, 0.0 }
 0x158   : > { %2287 = vmatprep.subr.msk.mxu1 %vm367_vm6, %v1552_v0  ;;  %2293 = vmatpush1.msk.msra.mxu0 %vm367_vm6, %v1767_v36  ;;  %v1769_v9 = vsel %vm3026_vm2, %v1761_v44, 0.0 }
 0x159   : > { %2288 = vmatpush1.msk.msra.mxu1 %vm367_vm6, %v1551_v63  ;;  %v1969_v8 = vpop.permute.xlu1 %1968  ;;  %1852 = vmatprep.mubr.f32.mxu0 %v2436_v28  ;;  %v1975_v5 = vpop.permute.xlu0 %1974 }
 0x15a   : > { %v1978_v51 = vsel %vm1976_vm0, %v1969_v8, %v2805_v30  ;;  %2289 = vmatmul.mubr.msk.f32.vlgmr.msra.gmra.mxu1 %vm363_vm10, %v2283_v58  ;;  %2295 = vmatprep.subr.msk.mxu1 %vm367_vm6, %v1770_v50 }
 0x15b   : > { %v1986_v7 = vsel %vm3009_vm1, %v1978_v51, 0.0  ;;  %2294 = vmatmul.mubr.msk.f32.vlgmr.msra.gmra.mxu0 %vm363_vm10, %v2291_v3  ;;  %2296 = vmatpush1.msk.msra.mxu1 %vm367_vm6, %v1769_v9 }
 0x15c   : > { %2300 = vmatprep.subr.msk.mxu0 %vm367_vm6, %v1986_v7  ;;  %1923 = vmatprep.mubr.f32.mxu1 %v2436_v28 }
 0x15d   : > { %v1973_v10 = vpop.permute.xlu1 %1972  ;;  %2070 = vmatprep.mubr.f32.mxu0 %v2436_v28 }
 0x15e   : > { %v1979_v11 = vsel %vm1976_vm0, %v2805_v30, %v1973_v10  ;;  %v1980_v12 = vsel %vm1976_vm0, %v1973_v10, %v1975_v5  ;;  %2297 = vmatmul.mubr.msk.f32.vlgmr.msra.gmra.mxu1 %vm363_vm10, %v2291_v3 }
 0x15f   : > { %v1987_v31 = vsel %vm3048_vm3, %v1979_v11, 0.0  ;;  %v1988_v14 = vsel %vm1960_vm4, %v1980_v12, 0.0  ;;  %2141 = vmatprep.mubr.f32.mxu1 %v2436_v28 }
 0x160   : > { %2303 = vmatprep.subr.msk.mxu1 %vm367_vm6, %v1988_v14 }
 0x161   : > { %2304 = vmatpush1.msk.msra.mxu1 %vm367_vm6, %v1987_v31  ;;  %v1967_v30 = vpop.permute.xlu1 %1966 }
 0x162   : > { %v1977_v15 = vsel %vm1976_vm0, %v1967_v30, %v1969_v8  ;;  %2305 = vmatmul.mubr.msk.f32.vlgmr.msra.gmra.mxu1 %vm363_vm10, %v2299_v57 }
 0x163   : > { %v1985_v21 = vsel %vm1957_vm5, %v1977_v15, 0.0 }
 0x164   : > { %2301 = vmatpush1.msk.msra.mxu0 %vm367_vm6, %v1985_v21 }
 0x165   : > { %2302 = vmatmul.mubr.msk.f32.vlgmr.msra.gmra.mxu0 %vm363_vm10, %v2299_v57 }
 0x1fa   : > { %v517_v16 = vpop.f32.mrf.mxu1 }
 0x1fc   : > { %v519_v18 = vpop.f32.mrf.mxu1 }
 0x1fe   : > { %v446_v54 = vpop.f32.mrf.mxu0 }
 0x200   : > { %v448_v28 = vpop.f32.mrf.mxu0 }
 0x202   : > { %v603_v17 = vpop.f32.mrf.mxu0 }
 0x203   : > { %v604_v29 = vadd.f32 %v603_v17, %v446_v54 }
 0x204   : > { %v605_v19 = vpop.f32.mrf.mxu0 }
 0x205   : > { %v606_v38 = vadd.f32 %v605_v19, %v448_v28 }
 0x206   : > { %v674_v20 = vpop.f32.mrf.mxu1  ;;  %v817_v35 = vpop.f32.mrf.mxu0 }
 0x207   : > { %v675_v61 = vadd.f32 %v674_v20, %v517_v16  ;;  %v893_v58 = vadd.f32 %v817_v35, %v604_v29 }
 0x208   : > { %v676_v40 = vpop.f32.mrf.mxu1  ;;  %v819_v42 = vpop.f32.mrf.mxu0 }
 0x209   : > { %v677_v39 = vadd.f32 %v676_v40, %v519_v18  ;;  %v894_v13 = vadd.f32 %v819_v42, %v606_v38 }
 0x20a   : > { %v888_v23 = vpop.f32.mrf.mxu1  ;;  %v1035_v24 = vpop.f32.mrf.mxu0 }
 0x20b   : > { %v895_v47 = vadd.f32 %v888_v23, %v675_v61  ;;  %v1111_v60 = vadd.f32 %v1035_v24, %v893_v58 }
 0x20c   : > { %v890_v33 = vpop.f32.mrf.mxu1  ;;  %v1037_v53 = vpop.f32.mrf.mxu0 }
 0x20d   : > { %v896_v48 = vadd.f32 %v890_v33, %v677_v39  ;;  %v1112_v36 = vadd.f32 %v1037_v53, %v894_v13 }
 0x20e   : > { %v1106_v45 = vpop.f32.mrf.mxu1 }
 0x20f   : > { %v1200_v25 = vpop.f32.mrf.mxu0  ;;  %v1113_v55 = vadd.f32 %v1106_v45, %v895_v47 }
 0x210   : > { %v1108_v1 = vpop.f32.mrf.mxu1  ;;  %v1276_v62 = vadd.f32 %v1200_v25, %v1111_v60 }
 0x211   : > { %v1202_v22 = vpop.f32.mrf.mxu0  ;;  %v1114_v63 = vadd.f32 %v1108_v1, %v896_v48 }
 0x212   : > { %v1271_v26 = vpop.f32.mrf.mxu1  ;;  %v1277_v44 = vadd.f32 %v1202_v22, %v1112_v36 }
 0x213   : > { %v1418_v27 = vpop.f32.mrf.mxu0  ;;  %v1278_v0 = vadd.f32 %v1271_v26, %v1113_v55 }
 0x214   : > { %v1273_v43 = vpop.f32.mrf.mxu1  ;;  %v1494_v8 = vadd.f32 %v1418_v27, %v1276_v62 }
 0x215   : > { %v1420_v34 = vpop.f32.mrf.mxu0  ;;  %v1279_v3 = vadd.f32 %v1273_v43, %v1114_v63 }
 0x216   : > { %v1489_v37 = vpop.f32.mrf.mxu1  ;;  %v1495_v5 = vadd.f32 %v1420_v34, %v1277_v44 }
 0x217   : > { %v1636_v32 = vpop.f32.mrf.mxu0  ;;  %v1496_v4 = vadd.f32 %v1489_v37, %v1278_v0 }
 0x218   : > { %v1491_v52 = vpop.f32.mrf.mxu1  ;;  %v1712_v9 = vadd.f32 %v1636_v32, %v1494_v8 }
 0x219   : > { %v1638_v56 = vpop.f32.mrf.mxu0  ;;  %v1497_v51 = vadd.f32 %v1491_v52, %v1279_v3 }
 0x21a   : > { %v1707_v59 = vpop.f32.mrf.mxu1  ;;  %v1713_v12 = vadd.f32 %v1638_v56, %v1495_v5 }
 0x21b   : > { %v1854_v6 = vpop.f32.mrf.mxu0  ;;  %v1714_v50 = vadd.f32 %v1707_v59, %v1496_v4 }
 0x21c   : > { %v1709_v2 = vpop.f32.mrf.mxu1  ;;  %v1930_v31 = vadd.f32 %v1854_v6, %v1712_v9 }
 0x21d   : > { %v1715_v46 = vadd.f32 %v1709_v2, %v1497_v51  ;;  %v1856_v10 = vpop.f32.mrf.mxu0 }
 0x21e   : > { %v1925_v41 = vpop.f32.mrf.mxu1  ;;  %v1931_v21 = vadd.f32 %v1856_v10, %v1713_v12 }
 0x21f   : > { %v1932_v49 = vadd.f32 %v1925_v41, %v1714_v50 }
 0x220   : > { %v1927_v7 = vpop.f32.mrf.mxu1 }
 0x221   : > { %v1933_v14 = vadd.f32 %v1927_v7, %v1715_v46 }
 0x222   : > { %v2143_v11 = vpop.f32.mrf.mxu1 }
 0x223   : > { %v2150_v57 = vadd.f32 %v2143_v11, %v1932_v49 }
 0x224   : > { %v2145_v30 = vpop.f32.mrf.mxu1 }
 0x225   : > { %v2072_v15 = vpop.f32.mrf.mxu0  ;;  %2154 = vst [vmem:[%s217_s11 + $0x10] sm:$0xff] %v2150_v57  ;;  %v2151_v54 = vadd.f32 %v2145_v30, %v1933_v14 }
 0x226   : > { %v2148_v16 = vadd.f32 %v2072_v15, %v1930_v31 }
 0x227   : > { %v2074_v28 = vpop.f32.mrf.mxu0  ;;  %2155 = vst [vmem:[%s217_s11 + $0x18] sm:$0xff] %v2151_v54 }
 0x228   : > { %2152 = vst [vmem:[%s217_s11] sm:$0xff] %v2148_v16  ;;  %v2149_v17 = vadd.f32 %v2074_v28, %v1931_v21 }
 0x22a   : > { %2153 = vst [vmem:[%s217_s11 + $0x8] sm:$0xff] %v2149_v17 }
 0x22b   : > { %2379 = shalt.err (!%p2376_p3)
}
 0x22c   : > { %s2380_s26 = scalar_lea.hbm %s2169_s15, 512  ;;  %s2384_s7 = scalar_lea.hbm %s3116_s5, 1024 }
 0x22d   : > { %p2381_p4 = scmp.ne.s32.totalorder %s2169_s15, %s2380_s26  ;;  %p2385_p9 = scmp.lt.s32.totalorder %s2169_s15, %s3116_s5 }
 0x22e   : > { %p2386_p10 = scmp.lt.s32.totalorder %s2384_s7, %s2380_s26 }
 0x22f   : > { %p2382_p7 = pnand %p2381_p4, %p2508_p5 }
 0x230   : > { %p2387_p11 = por %p2386_p10, %p2385_p9 }
 0x231   : > { %p2383_p8 = pneg %p2382_p7 }
 0x233   : > { %p2388_p12 = pnand %p2387_p11, %p2383_p8 }
 0x235   : > { %2391 = shalt.err (!%p2388_p12)
}
 0x236   : > { %2313 = dma.vmem_to_hbm [thread:$0]  (%p2508_p5), %s2172_s12, 512, %s2169_s15, %s2157_s16  }
 0x237 PF: > { %p2319_p13 = scmp.ge.s32.totalorder %s2426_s21, 2  ;;  %s2183_s10 = sand.u32 1, %s2414_s18  }
 0x238   : > { %s2184_s11 = scalar_lea.sflag [#allocation4], %s2183_s10 }
 0x239   : > { %p2316_p0 = pnand %p2319_p13, %p2512_p6 }
 0x23b   : > { %p2317_p1 = pneg %p2316_p0 }
 0x23d   : > { %2409 = dma.done.wait (%p2317_p1), %s2184_s11, 512  }
 0x23e   : > { %2411 = vsyncadd (%p2317_p1), %s2184_s11, 4294966784  ;;  %p15_p2 = scmp.ge.s32.totalorder %s2495_s24, 4   ;;  %s3179_s18 = smov %s2418_s19 }
 0x23f   : > { %s3180_s19 = smov %s2422_s20  ;;  %s3181_s20 = smov %s2506_s27 }
 0x240   : > { %s3182_s21 = smov %s2495_s24  ;;  %17 = sbr.rel (!%p15_p2) target bundleno = 3 (0x3), region = 90 }
 0x245   :  { %2189 = vsyncpa [#allocation4], 1 }
 0x246   :  { %2191 = vsyncpa [#allocation4 + $0x1], 1 }

</bundles_post_ra>
